<compile_context>
chip_gen: v7x
topology: tpu7x:2x2x1
jax: 0.10.0
libtpu: 0.0.40
codegen_flags: <defaults>
</compile_context>

<pallas_src>
import functools

import jax
import jax.numpy as jnp
import numpy as np
from jax.experimental import pallas as pl
from jax.experimental.pallas import tpu as pltpu


def _round_up(v, mult):
    return (v + mult - 1) // mult * mult


def _tno_kernel(x_ref, t_ref, o_ref, *, n, m_blk, bcast_load):
    """One (m_blk x lane_tile) output tile of the Toeplitz contraction.

    x_ref: (x_rows, ct)  inputs with batch folded into lanes (zero padded rows)
    t_ref: (l_win, ct)   this m-tile's extended-table window:
                         t_ref[k, c] = t[(i0 + k - (n-1)) mod 2l, c]
    o_ref: (m_blk, ct)   outputs with batch folded into lanes
    """
    ct = x_ref.shape[-1]

    def x_row(j):
        if bcast_load:
            # Stride-0 sublane-broadcast load: row j replicated across m_blk
            # sublanes (vld slot, nearly free).
            return x_ref[pl.ds(j, m_blk, stride=0), :].astype(jnp.float32)
        # Fallback: load one row; the multiply broadcasts it across sublanes.
        return x_ref[pl.ds(j, 1), :].astype(jnp.float32)

    def t_win(j):
        # t_win(j)[i, :] = t[(i0 + i - j) mod 2l, :] for i in [0, m_blk)
        return t_ref[pl.ds(n - 1 - j, m_blk), :].astype(jnp.float32)

    acc = jnp.zeros((m_blk, ct), jnp.float32)
    if n <= 64:
        # Small n: full static unroll (static slice starts, full scheduler view).
        for j in range(n):
            acc = acc + x_row(j) * t_win(j)
    else:
        # Large n: bounded code size / vreg pressure.
        # TODO(synk): this path uses dynamic (unaligned) sublane window starts;
        # if a future Mosaic rejects them, switch to chunked static windows.
        def body(j, a):
            return a + x_row(j) * t_win(j)
        acc = jax.lax.fori_loop(0, n, body, acc, unroll=8)

    o_ref[...] = acc.astype(o_ref.dtype)


def tno_fft(x, t, m=None):
    """Pallas implementation of TnoFFT.forward.

    Args:
      x: (b, n, d)
      t: (2 * max(n, m), d)  laid out as t0..t_{l-1}, t0, t_{-(l-1)}..t_{-1}
      m: output length (defaults to n)
    Returns:
      o: (b, m, d)
    """
    b, n, d = x.shape
    if m is None:
        m = n
    l = max(n, m)
    assert t.shape == (2 * l, d), (t.shape, (2 * l, d))

    # ---- output-row tiling (keeps the accumulator within vreg budget) -------
    m_pad8 = _round_up(m, 8)
    if m_pad8 <= 256:
        m_blk, grid_m = m_pad8, 1
    else:
        m_blk = 128
        grid_m = pl.cdiv(m_pad8, m_blk)
    m_pad = grid_m * m_blk

    # Rows of the extended table each m-tile needs.
    l_win = _round_up(n - 1 + m_blk, 8)

    # ---- fold batch into lanes: lane c = b_i * d + d_i ----------------------
    c = b * d
    c_pad = _round_up(c, 128)

    # Per-m-tile extended-table windows, flattened along rows:
    #   t_ext[mi * l_win + k, dd] = t[(mi * m_blk + k - (n - 1)) mod 2l, dd]
    k_idx = jnp.arange(l_win)
    mi_idx = jnp.arange(grid_m)
    gidx = (mi_idx[:, None] * m_blk + k_idx[None, :] - (n - 1)) % (2 * l)
    t_ext = t[gidx.reshape(-1)]                      # (grid_m * l_win, d)

    x2 = jnp.transpose(x, (1, 0, 2)).reshape(n, c)   # (n, b*d)
    t2 = jnp.tile(t_ext, (1, b))                     # (grid_m*l_win, b*d)

    # Pad x rows to >= m_blk so the stride-0 broadcast slice is always in-bounds.
    x_rows = _round_up(max(n, m_blk), 8)
    x2 = jnp.pad(x2, ((0, x_rows - n), (0, c_pad - c)))
    t2 = jnp.pad(t2, ((0, 0), (0, c_pad - c)))

    # ---- lane tile: biggest candidate dividing c_pad that fits the budgets --
    reg_cap = max(128, (32 * 8 * 128 // m_blk) // 128 * 128)   # acc <= ~32 vregs
    vmem_budget = 8 * 1024 * 1024                               # double-buffered tiles
    lane_tile = 128
    for cand in sorted({c_pad, 2048, 1024, 512, 256, 128}, reverse=True):
        if (cand <= c_pad and c_pad % cand == 0 and cand <= reg_cap
                and (x_rows + l_win + m_blk) * cand * 4 * 2 <= vmem_budget):
            lane_tile = cand
            break
    grid_c = c_pad // lane_tile

    def run(bcast_load):
        kernel = functools.partial(_tno_kernel, n=n, m_blk=m_blk,
                                   bcast_load=bcast_load)
        return pl.pallas_call(
            kernel,
            out_shape=jax.ShapeDtypeStruct((m_pad, c_pad), x.dtype),
            grid_spec=pltpu.PrefetchScalarGridSpec(
                num_scalar_prefetch=0,
                grid=(grid_c, grid_m),
                in_specs=[
                    pl.BlockSpec((x_rows, lane_tile), lambda ci, mi: (0, ci)),
                    pl.BlockSpec((l_win, lane_tile), lambda ci, mi: (mi, ci)),
                ],
                out_specs=pl.BlockSpec((m_blk, lane_tile), lambda ci, mi: (mi, ci)),
            ),
            compiler_params=pltpu.CompilerParams(
                dimension_semantics=("parallel", "parallel"),
                vmem_limit_bytes=32 * 1024 * 1024,
            ),
        )(x2, t2)

    try:
        o2 = run(bcast_load=True)        # stride-0 broadcast load (vld slot)
    except Exception:                    # lowering fallback, identical math
        o2 = run(bcast_load=False)

    # Trim padding and unfold batch from lanes: (m_pad, c_pad) -> (b, m, d).
    o = o2[:m, :c].reshape(m, b, d)
    return jnp.transpose(o, (1, 0, 2))


def tno_fft_ref(x, t, m=None):
    """Pure-JAX reference matching the PyTorch FFT path exactly."""
    n = x.shape[1]
    if m is None:
        m = n
    l = max(n, m)
    x_fft = jnp.fft.rfft(x, 2 * l, axis=-2)
    t_fft = jnp.fft.rfft(t[None], 2 * l, axis=-2)
    o = jnp.fft.irfft(x_fft * t_fft, 2 * l, axis=-2)[:, :m]
    return o


if __name__ == "__main__":
    key = jax.random.PRNGKey(0)
    kx, kt, kt2, kx3, kt3, kx4, kt4 = jax.random.split(key, 7)

    # Case 1: m = None (m = n), the module's default path.
    b, n, d = 2, 8, 32
    x = jax.random.normal(kx, (b, n, d), dtype=jnp.float32)
    t = jax.random.normal(kt, (2 * n, d), dtype=jnp.float32)
    o = jax.block_until_ready(tno_fft(x, t, m=None))
    assert o.shape == (b, n, d) and o.dtype == jnp.float32
    o_ref = jax.block_until_ready(tno_fft_ref(x, t, m=None))
    np.testing.assert_allclose(np.asarray(o), np.asarray(o_ref),
                               atol=1e-3, rtol=1e-3)

    # Case 2: m > n exercises the extended-table windowing (l = m).
    m2 = 12
    t_big = jax.random.normal(kt2, (2 * m2, d), dtype=jnp.float32)
    o2 = jax.block_until_ready(tno_fft(x, t_big, m=m2))
    assert o2.shape == (b, m2, d)
    o2_ref = jax.block_until_ready(tno_fft_ref(x, t_big, m=m2))
    np.testing.assert_allclose(np.asarray(o2), np.asarray(o2_ref),
                               atol=1e-3, rtol=1e-3)

    # Case 3: non-power-of-two lanes (b*d = 300 -> 384) and m not multiple of 8's
    # worth of extra rows; exercises lane padding and a 384-wide lane tile.
    b3, n3, m3, d3 = 3, 24, 40, 100
    x3 = jax.random.normal(kx3, (b3, n3, d3), dtype=jnp.float32)
    t3 = jax.random.normal(kt3, (2 * m3, d3), dtype=jnp.float32)
    o3 = jax.block_until_ready(tno_fft(x3, t3, m=m3))
    assert o3.shape == (b3, m3, d3)
    o3_ref = jax.block_until_ready(tno_fft_ref(x3, t3, m=m3))
    np.testing.assert_allclose(np.asarray(o3), np.asarray(o3_ref),
                               atol=2e-3, rtol=2e-3)

    # Case 4: large m (> 256) exercises the m-tiled grid axis (grid_m = 3) with
    # per-tile table windows; n stays in the static-unroll regime.
    b4, n4, m4, d4 = 2, 32, 300, 64
    x4 = jax.random.normal(kx4, (b4, n4, d4), dtype=jnp.float32)
    t4 = jax.random.normal(kt4, (2 * m4, d4), dtype=jnp.float32)
    o4 = jax.block_until_ready(tno_fft(x4, t4, m=m4))
    assert o4.shape == (b4, m4, d4)
    o4_ref = jax.block_until_ready(tno_fft_ref(x4, t4, m=m4))
    np.testing.assert_allclose(np.asarray(o4), np.asarray(o4_ref),
                               atol=2e-3, rtol=2e-3)

    print("KERNEL_OK")
</pallas_src>

<mosaic_0001>
module attributes {stable_mosaic.version = 11 : i64} {
  func.func @_tno_kernel(%arg0: i32, %arg1: i32, %arg2: memref<8x128xf32, #tpu.memory_space<vmem>>, %arg3: memref<16x128xf32, #tpu.memory_space<vmem>>, %arg4: memref<8x128xf32, #tpu.memory_space<vmem>>) attributes {dimension_semantics = [#tpu.dimension_semantics<parallel>, #tpu.dimension_semantics<parallel>], iteration_bounds = array<i64: 1, 1>, scalar_prefetch = 0 : i64, scratch_operands = 0 : i64, tpu.core_type = #tpu.core_type<tc>, window_params = [{transform_indices = @transform_0, window_bounds = array<i64: 8, 128>}, {transform_indices = @transform_1, window_bounds = array<i64: 16, 128>}, {transform_indices = @transform_2, window_bounds = array<i64: 8, 128>}]} {
    %cst = arith.constant 0.000000e+00 : f32
    %0 = vector.broadcast %cst : f32 to vector<8x128xf32>
    %c0 = arith.constant 0 : index
    %c0_0 = arith.constant 0 : index
    %1 = tpu.strided_load %arg2[%c0, %c0_0] {strides = array<i32: 0, 1>} : memref<8x128xf32, #tpu.memory_space<vmem>>, vector<8x128xf32>
    %c7 = arith.constant 7 : index
    %c0_1 = arith.constant 0 : index
    %2 = vector.load %arg3[%c7, %c0_1] : memref<16x128xf32, #tpu.memory_space<vmem>>, vector<8x128xf32>
    %3 = arith.mulf %1, %2 : vector<8x128xf32>
    %4 = arith.addf %0, %3 : vector<8x128xf32>
    %c1 = arith.constant 1 : index
    %c0_2 = arith.constant 0 : index
    %5 = tpu.strided_load %arg2[%c1, %c0_2] {strides = array<i32: 0, 1>} : memref<8x128xf32, #tpu.memory_space<vmem>>, vector<8x128xf32>
    %c6 = arith.constant 6 : index
    %c0_3 = arith.constant 0 : index
    %6 = vector.load %arg3[%c6, %c0_3] : memref<16x128xf32, #tpu.memory_space<vmem>>, vector<8x128xf32>
    %7 = arith.mulf %5, %6 : vector<8x128xf32>
    %8 = arith.addf %4, %7 : vector<8x128xf32>
    %c2 = arith.constant 2 : index
    %c0_4 = arith.constant 0 : index
    %9 = tpu.strided_load %arg2[%c2, %c0_4] {strides = array<i32: 0, 1>} : memref<8x128xf32, #tpu.memory_space<vmem>>, vector<8x128xf32>
    %c5 = arith.constant 5 : index
    %c0_5 = arith.constant 0 : index
    %10 = vector.load %arg3[%c5, %c0_5] : memref<16x128xf32, #tpu.memory_space<vmem>>, vector<8x128xf32>
    %11 = arith.mulf %9, %10 : vector<8x128xf32>
    %12 = arith.addf %8, %11 : vector<8x128xf32>
    %c3 = arith.constant 3 : index
    %c0_6 = arith.constant 0 : index
    %13 = tpu.strided_load %arg2[%c3, %c0_6] {strides = array<i32: 0, 1>} : memref<8x128xf32, #tpu.memory_space<vmem>>, vector<8x128xf32>
    %c4 = arith.constant 4 : index
    %c0_7 = arith.constant 0 : index
    %14 = vector.load %arg3[%c4, %c0_7] : memref<16x128xf32, #tpu.memory_space<vmem>>, vector<8x128xf32>
    %15 = arith.mulf %13, %14 : vector<8x128xf32>
    %16 = arith.addf %12, %15 : vector<8x128xf32>
    %c4_8 = arith.constant 4 : index
    %c0_9 = arith.constant 0 : index
    %17 = tpu.strided_load %arg2[%c4_8, %c0_9] {strides = array<i32: 0, 1>} : memref<8x128xf32, #tpu.memory_space<vmem>>, vector<8x128xf32>
    %c3_10 = arith.constant 3 : index
    %c0_11 = arith.constant 0 : index
    %18 = vector.load %arg3[%c3_10, %c0_11] : memref<16x128xf32, #tpu.memory_space<vmem>>, vector<8x128xf32>
    %19 = arith.mulf %17, %18 : vector<8x128xf32>
    %20 = arith.addf %16, %19 : vector<8x128xf32>
    %c5_12 = arith.constant 5 : index
    %c0_13 = arith.constant 0 : index
    %21 = tpu.strided_load %arg2[%c5_12, %c0_13] {strides = array<i32: 0, 1>} : memref<8x128xf32, #tpu.memory_space<vmem>>, vector<8x128xf32>
    %c2_14 = arith.constant 2 : index
    %c0_15 = arith.constant 0 : index
    %22 = vector.load %arg3[%c2_14, %c0_15] : memref<16x128xf32, #tpu.memory_space<vmem>>, vector<8x128xf32>
    %23 = arith.mulf %21, %22 : vector<8x128xf32>
    %24 = arith.addf %20, %23 : vector<8x128xf32>
    %c6_16 = arith.constant 6 : index
    %c0_17 = arith.constant 0 : index
    %25 = tpu.strided_load %arg2[%c6_16, %c0_17] {strides = array<i32: 0, 1>} : memref<8x128xf32, #tpu.memory_space<vmem>>, vector<8x128xf32>
    %c1_18 = arith.constant 1 : index
    %c0_19 = arith.constant 0 : index
    %26 = vector.load %arg3[%c1_18, %c0_19] : memref<16x128xf32, #tpu.memory_space<vmem>>, vector<8x128xf32>
    %27 = arith.mulf %25, %26 : vector<8x128xf32>
    %28 = arith.addf %24, %27 : vector<8x128xf32>
    %c7_20 = arith.constant 7 : index
    %c0_21 = arith.constant 0 : index
    %29 = tpu.strided_load %arg2[%c7_20, %c0_21] {strides = array<i32: 0, 1>} : memref<8x128xf32, #tpu.memory_space<vmem>>, vector<8x128xf32>
    %c0_22 = arith.constant 0 : index
    %c0_23 = arith.constant 0 : index
    %30 = vector.load %arg3[%c0_22, %c0_23] : memref<16x128xf32, #tpu.memory_space<vmem>>, vector<8x128xf32>
    %31 = arith.mulf %29, %30 : vector<8x128xf32>
    %32 = arith.addf %28, %31 : vector<8x128xf32>
    %c0_24 = arith.constant 0 : index
    %c0_25 = arith.constant 0 : index
    %33 = vector.load %arg4[%c0_24, %c0_25] : memref<8x128xf32, #tpu.memory_space<vmem>>, vector<8x128xf32>
    tpu.vector_store %arg4[%c0_24, %c0_25], %32 {strides = array<i32>} : memref<8x128xf32, #tpu.memory_space<vmem>>, vector<8x128xf32>,
    return
  }
  func.func @transform_0(%arg0: i32, %arg1: i32) -> (i32, i32) {
    %c0_i32 = arith.constant 0 : i32
    %c0_i32_0 = arith.constant 0 : i32
    return %c0_i32, %arg0 : i32, i32
  }
  func.func @transform_1(%arg0: i32, %arg1: i32) -> (i32, i32) {
    %c0_i32 = arith.constant 0 : i32
    return %arg1, %arg0 : i32, i32
  }
  func.func @transform_2(%arg0: i32, %arg1: i32) -> (i32, i32) {
    %c0_i32 = arith.constant 0 : i32
    return %arg1, %arg0 : i32, i32
  }
}

module attributes {stable_mosaic.version = 11 : i64} {
  func.func @_tno_kernel(%arg0: i32, %arg1: i32, %arg2: memref<8x128xf32, #tpu.memory_space<vmem>>, %arg3: memref<16x128xf32, #tpu.memory_space<vmem>>, %arg4: memref<8x128xf32, #tpu.memory_space<vmem>>) attributes {dimension_semantics = [#tpu.dimension_semantics<parallel>, #tpu.dimension_semantics<parallel>], iteration_bounds = array<i64: 1, 1>, scalar_prefetch = 0 : i64, scratch_operands = 0 : i64, tpu.core_type = #tpu.core_type<tc>, window_params = [{transform_indices = @transform_0, window_bounds = array<i64: 8, 128>}, {transform_indices = @transform_1, window_bounds = array<i64: 16, 128>}, {transform_indices = @transform_2, window_bounds = array<i64: 8, 128>}]} {
    %cst = arith.constant 0.000000e+00 : f32
    %0 = vector.broadcast %cst : f32 to vector<8x128xf32>
    %c0 = arith.constant 0 : index
    %c0_0 = arith.constant 0 : index
    %1 = vector.load %arg2[%c0, %c0_0] : memref<8x128xf32, #tpu.memory_space<vmem>>, vector<1x128xf32>
    %c7 = arith.constant 7 : index
    %c0_1 = arith.constant 0 : index
    %2 = vector.load %arg3[%c7, %c0_1] : memref<16x128xf32, #tpu.memory_space<vmem>>, vector<8x128xf32>
    %3 = vector.broadcast %1 : vector<1x128xf32> to vector<8x128xf32>
    %4 = arith.mulf %3, %2 : vector<8x128xf32>
    %5 = arith.addf %0, %4 : vector<8x128xf32>
    %c1 = arith.constant 1 : index
    %c0_2 = arith.constant 0 : index
    %6 = vector.load %arg2[%c1, %c0_2] : memref<8x128xf32, #tpu.memory_space<vmem>>, vector<1x128xf32>
    %c6 = arith.constant 6 : index
    %c0_3 = arith.constant 0 : index
    %7 = vector.load %arg3[%c6, %c0_3] : memref<16x128xf32, #tpu.memory_space<vmem>>, vector<8x128xf32>
    %8 = vector.broadcast %6 : vector<1x128xf32> to vector<8x128xf32>
    %9 = arith.mulf %8, %7 : vector<8x128xf32>
    %10 = arith.addf %5, %9 : vector<8x128xf32>
    %c2 = arith.constant 2 : index
    %c0_4 = arith.constant 0 : index
    %11 = vector.load %arg2[%c2, %c0_4] : memref<8x128xf32, #tpu.memory_space<vmem>>, vector<1x128xf32>
    %c5 = arith.constant 5 : index
    %c0_5 = arith.constant 0 : index
    %12 = vector.load %arg3[%c5, %c0_5] : memref<16x128xf32, #tpu.memory_space<vmem>>, vector<8x128xf32>
    %13 = vector.broadcast %11 : vector<1x128xf32> to vector<8x128xf32>
    %14 = arith.mulf %13, %12 : vector<8x128xf32>
    %15 = arith.addf %10, %14 : vector<8x128xf32>
    %c3 = arith.constant 3 : index
    %c0_6 = arith.constant 0 : index
    %16 = vector.load %arg2[%c3, %c0_6] : memref<8x128xf32, #tpu.memory_space<vmem>>, vector<1x128xf32>
    %c4 = arith.constant 4 : index
    %c0_7 = arith.constant 0 : index
    %17 = vector.load %arg3[%c4, %c0_7] : memref<16x128xf32, #tpu.memory_space<vmem>>, vector<8x128xf32>
    %18 = vector.broadcast %16 : vector<1x128xf32> to vector<8x128xf32>
    %19 = arith.mulf %18, %17 : vector<8x128xf32>
    %20 = arith.addf %15, %19 : vector<8x128xf32>
    %c4_8 = arith.constant 4 : index
    %c0_9 = arith.constant 0 : index
    %21 = vector.load %arg2[%c4_8, %c0_9] : memref<8x128xf32, #tpu.memory_space<vmem>>, vector<1x128xf32>
    %c3_10 = arith.constant 3 : index
    %c0_11 = arith.constant 0 : index
    %22 = vector.load %arg3[%c3_10, %c0_11] : memref<16x128xf32, #tpu.memory_space<vmem>>, vector<8x128xf32>
    %23 = vector.broadcast %21 : vector<1x128xf32> to vector<8x128xf32>
    %24 = arith.mulf %23, %22 : vector<8x128xf32>
    %25 = arith.addf %20, %24 : vector<8x128xf32>
    %c5_12 = arith.constant 5 : index
    %c0_13 = arith.constant 0 : index
    %26 = vector.load %arg2[%c5_12, %c0_13] : memref<8x128xf32, #tpu.memory_space<vmem>>, vector<1x128xf32>
    %c2_14 = arith.constant 2 : index
    %c0_15 = arith.constant 0 : index
    %27 = vector.load %arg3[%c2_14, %c0_15] : memref<16x128xf32, #tpu.memory_space<vmem>>, vector<8x128xf32>
    %28 = vector.broadcast %26 : vector<1x128xf32> to vector<8x128xf32>
    %29 = arith.mulf %28, %27 : vector<8x128xf32>
    %30 = arith.addf %25, %29 : vector<8x128xf32>
    %c6_16 = arith.constant 6 : index
    %c0_17 = arith.constant 0 : index
    %31 = vector.load %arg2[%c6_16, %c0_17] : memref<8x128xf32, #tpu.memory_space<vmem>>, vector<1x128xf32>
    %c1_18 = arith.constant 1 : index
    %c0_19 = arith.constant 0 : index
    %32 = vector.load %arg3[%c1_18, %c0_19] : memref<16x128xf32, #tpu.memory_space<vmem>>, vector<8x128xf32>
    %33 = vector.broadcast %31 : vector<1x128xf32> to vector<8x128xf32>
    %34 = arith.mulf %33, %32 : vector<8x128xf32>
    %35 = arith.addf %30, %34 : vector<8x128xf32>
    %c7_20 = arith.constant 7 : index
    %c0_21 = arith.constant 0 : index
    %36 = vector.load %arg2[%c7_20, %c0_21] : memref<8x128xf32, #tpu.memory_space<vmem>>, vector<1x128xf32>
    %c0_22 = arith.constant 0 : index
    %c0_23 = arith.constant 0 : index
    %37 = vector.load %arg3[%c0_22, %c0_23] : memref<16x128xf32, #tpu.memory_space<vmem>>, vector<8x128xf32>
    %38 = vector.broadcast %36 : vector<1x128xf32> to vector<8x128xf32>
    %39 = arith.mulf %38, %37 : vector<8x128xf32>
    %40 = arith.addf %35, %39 : vector<8x128xf32>
    %c0_24 = arith.constant 0 : index
    %c0_25 = arith.constant 0 : index
    %41 = vector.load %arg4[%c0_24, %c0_25] : memref<8x128xf32, #tpu.memory_space<vmem>>, vector<8x128xf32>
    tpu.vector_store %arg4[%c0_24, %c0_25], %40 {strides = array<i32>} : memref<8x128xf32, #tpu.memory_space<vmem>>, vector<8x128xf32>,
    return
  }
  func.func @transform_0(%arg0: i32, %arg1: i32) -> (i32, i32) {
    %c0_i32 = arith.constant 0 : i32
    %c0_i32_0 = arith.constant 0 : i32
    return %c0_i32, %arg0 : i32, i32
  }
  func.func @transform_1(%arg0: i32, %arg1: i32) -> (i32, i32) {
    %c0_i32 = arith.constant 0 : i32
    return %arg1, %arg0 : i32, i32
  }
  func.func @transform_2(%arg0: i32, %arg1: i32) -> (i32, i32) {
    %c0_i32 = arith.constant 0 : i32
    return %arg1, %arg0 : i32, i32
  }
}

</mosaic_0001>

<bundles_post_ra>
// kernel: tpu_custom_call.1
= control target key start
LH: loop header
LB: loop body
LE: loop exit
PB: predicated region body
PF: predicated region fallthrough
CT: control target
= control target key end

     0   :  { %7 = vsyncpa [#allocation3], 0  ;;  %s227_s0 = inlined_call_operand.hbm [shape: f32[8,128], index: 0, kind: input, shape index: {}]   ;;  %s228_s1 = inlined_call_operand.hbm [shape: f32[16,128], index: 1, kind: input, shape index: {}]   ;;  %s229_s2 = inlined_call_operand.hbm [shape: f32[8,128], index: 2, kind: output, shape index: {}]  }
   0x1   :  { %8 = vsyncpa [#allocation6], 0 }
   0x2   :  { %9 = vsyncpa [#allocation4], 0  ;;  %s164_s9 = smov [#allocation2]   ;;  %s165_s11 = smov [#allocation5]  }
   0x3   :  { %s16_s10 = sshll.u32 %s164_s9, 4  ;;  %s25_s12 = sshll.u32 %s165_s11, 4  ;;  %s17_s10 = int_to_ptr.vmem [resolvable:$true] %s16_s10  ;;  %s184_s12 = int_to_ptr.vmem [resolvable:$true] %s25_s12 }
   0x4   :  { %s92_s15 = scalar_lea.hbm %s227_s0, 128 }
   0x5   :  { %p93_p0 = scmp.ne.s32.totalorder %s227_s0, %s92_s15  ;;  %p96_p1 = scmp.lt.u32.totalorder %s92_s15, %s227_s0 }
   0x7   :  { %p98_p2 = pnand %p96_p1, %p93_p0 }
   0x9   :  { %101 = shalt.err (!%p98_p2)
}
   0xa   :  { %s102_s20 = scalar_lea.vmem %s17_s10, 128  ;;  %p107_p4 = scmp.lt.s32.totalorder %s17_s10, %s17_s10 }
   0xb   :  { %p103_p3 = scmp.ne.s32.totalorder %s17_s10, %s102_s20  ;;  %p108_p5 = scmp.lt.s32.totalorder %s102_s20, %s102_s20 }
   0xd   :  { %p109_p6 = por %p108_p5, %p107_p4 }
   0xf   :  { %p110_p7 = pnand %p109_p6, %p103_p3 }
  0x11   :  { %113 = shalt.err (!%p110_p7)
}
  0x12   :  { %19 = dma.hbm_to_vmem [thread:$0]  %s227_s0, 128, %s17_s10, [#allocation3]  }
  0x13   :  { %s114_s25 = scalar_lea.hbm %s228_s1, 256 }
  0x14   :  { %p115_p8 = scmp.ne.s32.totalorder %s228_s1, %s114_s25  ;;  %p118_p9 = scmp.lt.u32.totalorder %s114_s25, %s228_s1 }
  0x16   :  { %p120_p10 = pnand %p118_p9, %p115_p8 }
  0x18   :  { %123 = shalt.err (!%p120_p10)
}
  0x19   :  { %s124_s30 = scalar_lea.vmem %s184_s12, 256  ;;  %p129_p12 = scmp.lt.s32.totalorder %s184_s12, %s184_s12 }
  0x1a   :  { %p125_p11 = scmp.ne.s32.totalorder %s184_s12, %s124_s30  ;;  %p130_p13 = scmp.lt.s32.totalorder %s124_s30, %s124_s30 }
  0x1c   :  { %p131_p0 = por %p130_p13, %p129_p12 }
  0x1e   :  { %p132_p1 = pnand %p131_p0, %p125_p11 }
  0x20   :  { %135 = shalt.err (!%p132_p1)
}
  0x21   :  { %s166_s0 = smov 128   ;;  %s167_s3 = smov 8  }
  0x22   :  { %31 = dma.hbm_to_vmem [thread:$0]  %s228_s1, 256, %s184_s12, [#allocation6], %s166_s0, %s166_s0, %s167_s3  }
  0x23   :  { %158 = dma.done.wait [#allocation3], 128  }
  0x24   :  { %159 = vsyncadd [#allocation3], 4294967168 }
  0x25   :  { %160 = dma.done.wait [#allocation6], 256  }
  0x26   :  { %161 = vsyncadd [#allocation6], 4294967040  ;;  %v38_v0 = vld [vmem:[#allocation2] ss:$0 sm:$0xff]  ;;  %v39_v1 = vld [vmem:[#allocation5 + $0x7] sm:$0xff]  ;;  %s168_s1 = smov [#allocation7]  }
  0x27   :  { %v42_v2 = vld [vmem:[#allocation2 + $0x1] ss:$0 sm:$0xff]  ;;  %v40_v3 = vmul.f32 %v39_v1, %v38_v0  ;;  %v43_v4 = vld [vmem:[#allocation5 + $0x6] sm:$0xff]  ;;  %v46_v5 = vld [vmem:[#allocation2 + $0x2] ss:$0 sm:$0xff]  ;;  %s77_s6 = sshll.u32 %s168_s1, 4  ;;  %s78_s6 = int_to_ptr.vmem [resolvable:$true] %s77_s6 }
  0x28   :  { %v47_v6 = vld [vmem:[#allocation5 + $0x5] sm:$0xff]  ;;  %v44_v7 = vmul.f32 %v43_v4, %v42_v2  ;;  %v50_v9 = vld [vmem:[#allocation2 + $0x3] ss:$0 sm:$0xff]  ;;  %v54_v11 = vld [vmem:[#allocation2 + $0x4] ss:$0 sm:$0xff]  ;;  %s136_s7 = scalar_lea.vmem %s78_s6, 128  ;;  %p141_p3 = scmp.lt.s32.totalorder %s78_s6, %s78_s6 }
  0x29   :  { %v48_v8 = vmul.f32 %v47_v6, %v46_v5  ;;  %v51_v10 = vld [vmem:[#allocation5 + $0x4] sm:$0xff]  ;;  %v58_v15 = vld [vmem:[#allocation2 + $0x5] ss:$0 sm:$0xff]  ;;  %v62_v19 = vld [vmem:[#allocation2 + $0x6] ss:$0 sm:$0xff]  ;;  %p137_p2 = scmp.ne.s32.totalorder %s78_s6, %s136_s7  ;;  %p142_p4 = scmp.lt.s32.totalorder %s136_s7, %s136_s7 }
  0x2a   :  { %v55_v12 = vld [vmem:[#allocation5 + $0x3] sm:$0xff]  ;;  %v45_v13 = vadd.f32 %v44_v7, %v40_v3  ;;  %v52_v14 = vmul.f32 %v51_v10, %v50_v9  ;;  %v66_v23 = vld [vmem:[#allocation2 + $0x7] ss:$0 sm:$0xff] }
  0x2b   :  { %v59_v16 = vld [vmem:[#allocation5 + $0x2] sm:$0xff]  ;;  %v56_v18 = vmul.f32 %v55_v12, %v54_v11  ;;  %p143_p5 = por %p142_p4, %p141_p3 }
  0x2c   :  { %v49_v17 = vadd.f32 %v48_v8, %v45_v13  ;;  %v63_v20 = vld [vmem:[#allocation5 + $0x1] sm:$0xff]  ;;  %v60_v22 = vmul.f32 %v59_v16, %v58_v15 }
  0x2d   :  { %v67_v24 = vld [vmem:[#allocation5] sm:$0xff]  ;;  %v64_v26 = vmul.f32 %v63_v20, %v62_v19  ;;  %p144_p6 = pnand %p143_p5, %p137_p2 }
  0x2e   :  { %v53_v21 = vadd.f32 %v52_v14, %v49_v17  ;;  %v68_v28 = vmul.f32 %v67_v24, %v66_v23 }
  0x30   :  { %v57_v25 = vadd.f32 %v56_v18, %v53_v21 }
  0x32   :  { %v61_v27 = vadd.f32 %v60_v22, %v57_v25 }
  0x34   :  { %v65_v29 = vadd.f32 %v64_v26, %v61_v27 }
  0x36   :  { %v69_v30 = vadd.f32 %v68_v28, %v65_v29 }
  0x38   :  { %70 = vst [vmem:[#allocation7] sm:$0xff] %v69_v30 }
  0x39   :  { %147 = shalt.err (!%p144_p6)
}
  0x3a   :  { %s148_s10 = scalar_lea.hbm %s229_s2, 128 }
  0x3b   :  { %p149_p7 = scmp.ne.s32.totalorder %s229_s2, %s148_s10  ;;  %p152_p8 = scmp.lt.u32.totalorder %s148_s10, %s229_s2 }
  0x3d   :  { %p154_p9 = pnand %p152_p8, %p149_p7 }
  0x3f   :  { %157 = shalt.err (!%p154_p9)
}
  0x40   :  { %80 = dma.vmem_to_hbm [thread:$0]  %s78_s6, 128, %s229_s2, [#allocation4]  }
  0x41   :  { %162 = dma.done.wait [#allocation4], 128  }
  0x42   :  { %163 = vsyncadd [#allocation4], 4294967168 }
  0x43   :  { %84 = vsyncpa [#allocation3], 1 }
  0x44   :  { %85 = vsyncpa [#allocation6], 1 }
  0x45   :  { %86 = vsyncpa [#allocation4], 1 }

// kernel: tpu_custom_call.1
= control target key start
LH: loop header
LB: loop body
LE: loop exit
PB: predicated region body
PF: predicated region fallthrough
CT: control target
= control target key end

     0   :  { %7 = vsyncpa [#allocation3], 0  ;;  %s267_s0 = inlined_call_operand.hbm [shape: f32[8,128], index: 0, kind: input, shape index: {}]   ;;  %s268_s1 = inlined_call_operand.hbm [shape: f32[16,128], index: 1, kind: input, shape index: {}]   ;;  %s269_s2 = inlined_call_operand.hbm [shape: f32[8,128], index: 2, kind: output, shape index: {}]  }
   0x1   :  { %8 = vsyncpa [#allocation6], 0 }
   0x2   :  { %9 = vsyncpa [#allocation4], 0  ;;  %s204_s9 = smov [#allocation2]   ;;  %s205_s11 = smov [#allocation5]  }
   0x3   :  { %s16_s10 = sshll.u32 %s204_s9, 4  ;;  %s25_s12 = sshll.u32 %s205_s11, 4  ;;  %s17_s10 = int_to_ptr.vmem [resolvable:$true] %s16_s10  ;;  %s224_s12 = int_to_ptr.vmem [resolvable:$true] %s25_s12 }
   0x4   :  { %s132_s15 = scalar_lea.hbm %s267_s0, 128 }
   0x5   :  { %p133_p0 = scmp.ne.s32.totalorder %s267_s0, %s132_s15  ;;  %p136_p1 = scmp.lt.u32.totalorder %s132_s15, %s267_s0 }
   0x7   :  { %p138_p2 = pnand %p136_p1, %p133_p0 }
   0x9   :  { %141 = shalt.err (!%p138_p2)
}
   0xa   :  { %s142_s20 = scalar_lea.vmem %s17_s10, 128  ;;  %p147_p4 = scmp.lt.s32.totalorder %s17_s10, %s17_s10 }
   0xb   :  { %p143_p3 = scmp.ne.s32.totalorder %s17_s10, %s142_s20  ;;  %p148_p5 = scmp.lt.s32.totalorder %s142_s20, %s142_s20 }
   0xd   :  { %p149_p6 = por %p148_p5, %p147_p4 }
   0xf   :  { %p150_p7 = pnand %p149_p6, %p143_p3 }
  0x11   :  { %153 = shalt.err (!%p150_p7)
}
  0x12   :  { %19 = dma.hbm_to_vmem [thread:$0]  %s267_s0, 128, %s17_s10, [#allocation3]  }
  0x13   :  { %s154_s25 = scalar_lea.hbm %s268_s1, 256 }
  0x14   :  { %p155_p8 = scmp.ne.s32.totalorder %s268_s1, %s154_s25  ;;  %p158_p9 = scmp.lt.u32.totalorder %s154_s25, %s268_s1 }
  0x16   :  { %p160_p10 = pnand %p158_p9, %p155_p8 }
  0x18   :  { %163 = shalt.err (!%p160_p10)
}
  0x19   :  { %s164_s30 = scalar_lea.vmem %s224_s12, 256  ;;  %p169_p12 = scmp.lt.s32.totalorder %s224_s12, %s224_s12 }
  0x1a   :  { %p165_p11 = scmp.ne.s32.totalorder %s224_s12, %s164_s30  ;;  %p170_p13 = scmp.lt.s32.totalorder %s164_s30, %s164_s30 }
  0x1c   :  { %p171_p0 = por %p170_p13, %p169_p12 }
  0x1e   :  { %p172_p1 = pnand %p171_p0, %p165_p11 }
  0x20   :  { %175 = shalt.err (!%p172_p1)
}
  0x21   :  { %s206_s0 = smov 128   ;;  %s207_s3 = smov 8  }
  0x22   :  { %31 = dma.hbm_to_vmem [thread:$0]  %s268_s1, 256, %s224_s12, [#allocation6], %s206_s0, %s206_s0, %s207_s3  }
  0x23   :  { %198 = dma.done.wait [#allocation3], 128  }
  0x24   :  { %199 = vsyncadd [#allocation3], 4294967168 }
  0x25   :  { %200 = dma.done.wait [#allocation6], 256  }
  0x26   :  { %201 = vsyncadd [#allocation6], 4294967040  ;;  %v119_v0 = vld [vmem:[#allocation2] ss:$0 sm:$0xff]  ;;  %v39_v1 = vld [vmem:[#allocation5 + $0x7] sm:$0xff]  ;;  %s208_s1 = smov [#allocation7]  }
  0x27   :  { %v120_v2 = vld [vmem:[#allocation2 + $0x1] ss:$0 sm:$0xff]  ;;  %v44_v3 = vmul.f32 %v119_v0, %v39_v1  ;;  %v47_v4 = vld [vmem:[#allocation5 + $0x6] sm:$0xff]  ;;  %v121_v5 = vld [vmem:[#allocation2 + $0x2] ss:$0 sm:$0xff]  ;;  %s109_s6 = sshll.u32 %s208_s1, 4  ;;  %s110_s6 = int_to_ptr.vmem [resolvable:$true] %s109_s6 }
  0x28   :  { %v55_v6 = vld [vmem:[#allocation5 + $0x5] sm:$0xff]  ;;  %v52_v7 = vmul.f32 %v120_v2, %v47_v4  ;;  %v122_v9 = vld [vmem:[#allocation2 + $0x3] ss:$0 sm:$0xff]  ;;  %v123_v11 = vld [vmem:[#allocation2 + $0x4] ss:$0 sm:$0xff]  ;;  %s176_s7 = scalar_lea.vmem %s110_s6, 128  ;;  %p181_p3 = scmp.lt.s32.totalorder %s110_s6, %s110_s6 }
  0x29   :  { %v60_v8 = vmul.f32 %v121_v5, %v55_v6  ;;  %v63_v10 = vld [vmem:[#allocation5 + $0x4] sm:$0xff]  ;;  %v124_v15 = vld [vmem:[#allocation2 + $0x5] ss:$0 sm:$0xff]  ;;  %v125_v19 = vld [vmem:[#allocation2 + $0x6] ss:$0 sm:$0xff]  ;;  %p177_p2 = scmp.ne.s32.totalorder %s110_s6, %s176_s7  ;;  %p182_p4 = scmp.lt.s32.totalorder %s176_s7, %s176_s7 }
  0x2a   :  { %v71_v12 = vld [vmem:[#allocation5 + $0x3] sm:$0xff]  ;;  %v53_v13 = vadd.f32 %v52_v7, %v44_v3  ;;  %v68_v14 = vmul.f32 %v122_v9, %v63_v10  ;;  %v126_v23 = vld [vmem:[#allocation2 + $0x7] ss:$0 sm:$0xff] }
  0x2b   :  { %v79_v16 = vld [vmem:[#allocation5 + $0x2] sm:$0xff]  ;;  %v76_v18 = vmul.f32 %v123_v11, %v71_v12  ;;  %p183_p5 = por %p182_p4, %p181_p3 }
  0x2c   :  { %v61_v17 = vadd.f32 %v60_v8, %v53_v13  ;;  %v87_v20 = vld [vmem:[#allocation5 + $0x1] sm:$0xff]  ;;  %v84_v22 = vmul.f32 %v124_v15, %v79_v16 }
  0x2d   :  { %v95_v24 = vld [vmem:[#allocation5] sm:$0xff]  ;;  %v92_v26 = vmul.f32 %v125_v19, %v87_v20  ;;  %p184_p6 = pnand %p183_p5, %p177_p2 }
  0x2e   :  { %v69_v21 = vadd.f32 %v68_v14, %v61_v17  ;;  %v100_v28 = vmul.f32 %v126_v23, %v95_v24 }
  0x30   :  { %v77_v25 = vadd.f32 %v76_v18, %v69_v21 }
  0x32   :  { %v85_v27 = vadd.f32 %v84_v22, %v77_v25 }
  0x34   :  { %v93_v29 = vadd.f32 %v92_v26, %v85_v27 }
  0x36   :  { %v101_v30 = vadd.f32 %v100_v28, %v93_v29 }
  0x38   :  { %102 = vst [vmem:[#allocation7] sm:$0xff] %v101_v30 }
  0x39   :  { %187 = shalt.err (!%p184_p6)
}
  0x3a   :  { %s188_s10 = scalar_lea.hbm %s269_s2, 128 }
  0x3b   :  { %p189_p7 = scmp.ne.s32.totalorder %s269_s2, %s188_s10  ;;  %p192_p8 = scmp.lt.u32.totalorder %s188_s10, %s269_s2 }
  0x3d   :  { %p194_p9 = pnand %p192_p8, %p189_p7 }
  0x3f   :  { %197 = shalt.err (!%p194_p9)
}
  0x40   :  { %112 = dma.vmem_to_hbm [thread:$0]  %s110_s6, 128, %s269_s2, [#allocation4]  }
  0x41   :  { %202 = dma.done.wait [#allocation4], 128  }
  0x42   :  { %203 = vsyncadd [#allocation4], 4294967168 }
  0x43   :  { %116 = vsyncpa [#allocation3], 1 }
  0x44   :  { %117 = vsyncpa [#allocation6], 1 }
  0x45   :  { %118 = vsyncpa [#allocation4], 1 }

</bundles_post_ra>
